<compile_context>
chip_gen: v7x
topology: tpu7x:2x2x1
jax: 0.10.0
libtpu: 0.0.40
codegen_flags: <defaults>
</compile_context>

<pallas_src>
import jax
import jax.numpy as jnp
import numpy as np
from jax.experimental import pallas as pl
from jax.experimental.pallas import tpu as pltpu

EMBEDDING_DIM = 16
HIDDEN_DIM = 32
SEQ_LEN = 8
CUBE_DIM = 6
CUBE_PAD = 8            # cube padded to 8 lanes so the head slab stays 8-sublane aligned
FC_DIM = 128
OUT_DIM = 3
OUT_PAD = 128           # lane-dense output; wrapper slices [:OUT_DIM]

_GATES = 4 * HIDDEN_DIM  # 128


def lstm_mlp_kernel(embeds_ref, lstm_ref, head_ref, cube_ref, out_ref):
    H, E = HIDDEN_DIM, EMBEDDING_DIM

    # --- unpack the packed LSTM slab (static, 8-aligned sublane slices) -------
    w_ih = lstm_ref[pl.ds(0, E), :]          # (E, 4H)  g-gate cols pre-scaled by 2
    w_hh = lstm_ref[pl.ds(E, H), :]          # (H, 4H)
    b    = lstm_ref[pl.ds(E + H, 1), :]      # (1, 4H)

    # --- input projection hoisted out of the recurrent loop (single MXU op) ---
    x_proj = jnp.dot(embeds_ref[...], w_ih,
                     preferred_element_type=jnp.float32) + b      # (S, 4H)

    # Per-lane post-affine: one sigmoid over the full (1,4H) gates vreg gives
    # sigmoid on i/f/o lanes and tanh (= 2*sigmoid(2x)-1) on the pre-scaled g lanes.
    lane = jax.lax.broadcasted_iota(jnp.int32, (1, _GATES), 1)
    is_g = jnp.logical_and(lane >= 2 * H, lane < 3 * H)
    post_mul = jnp.where(is_g, 2.0, 1.0).astype(jnp.float32)
    post_add = jnp.where(is_g, -1.0, 0.0).astype(jnp.float32)

    h = jnp.zeros((1, H), jnp.float32)
    c = jnp.zeros((1, H), jnp.float32)

    # Static unroll over timesteps (SEQ_LEN is a small compile-time constant):
    # per step: 1 MXU matmul, 1 sigmoid + 1 tanh EUP push, a handful of VPU ops.
    for t in range(SEQ_LEN):
        gates = x_proj[t:t + 1, :] + jnp.dot(
            h, w_hh, preferred_element_type=jnp.float32)          # (1, 4H)
        act = jax.nn.sigmoid(gates) * post_mul + post_add
        i_g = act[:, 0 * H:1 * H]
        f_g = act[:, 1 * H:2 * H]
        g_g = act[:, 2 * H:3 * H]
        o_g = act[:, 3 * H:4 * H]
        c = f_g * c + i_g * g_g
        h = o_g * jnp.tanh(c)

    # --- folded linear head: fc3(fc2(fc1([h; cube]))) == h@Wh + cube@Wc + b ---
    w_h = head_ref[pl.ds(0, H), :]                     # (H, OUT_PAD)
    w_c = head_ref[pl.ds(H, CUBE_PAD), :]              # (CUBE_PAD, OUT_PAD)
    b_h = head_ref[pl.ds(H + CUBE_PAD, 1), :]          # (1, OUT_PAD)
    out_ref[...] = (jnp.dot(h, w_h, preferred_element_type=jnp.float32)
                    + jnp.dot(cube_ref[...], w_c, preferred_element_type=jnp.float32)
                    + b_h)                             # (1, OUT_PAD), lane-dense store


def init_params(key):
    """Deterministic parameter init with PyTorch-like shapes."""
    H, E = HIDDEN_DIM, EMBEDDING_DIM
    ks = jax.random.split(key, 10)
    s_lstm = 1.0 / np.sqrt(H)
    s_fc1 = 1.0 / np.sqrt(H + CUBE_DIM)
    s_fc2 = 1.0 / np.sqrt(FC_DIM)
    u = lambda k, shape, s: jax.random.uniform(k, shape, jnp.float32, -s, s)
    return {
        "w_ih": u(ks[0], (4 * H, E), s_lstm),
        "w_hh": u(ks[1], (4 * H, H), s_lstm),
        "b_ih": u(ks[2], (4 * H,), s_lstm),
        "b_hh": u(ks[3], (4 * H,), s_lstm),
        "fc1_w": u(ks[4], (FC_DIM, H + CUBE_DIM), s_fc1),
        "fc1_b": u(ks[5], (FC_DIM,), s_fc1),
        "fc2_w": u(ks[6], (FC_DIM, FC_DIM), s_fc2),
        "fc2_b": u(ks[7], (FC_DIM,), s_fc2),
        "fc3_w": u(ks[8], (OUT_DIM, FC_DIM), s_fc2),
        "fc3_b": u(ks[9], (OUT_DIM,), s_fc2),
    }


def pack_params(p):
    """Offline folding/packing of parameters into two lane-dense f32 slabs."""
    H = HIDDEN_DIM

    # LSTM weights transposed to (in, 4H); g-gate columns pre-scaled by 2 so the
    # in-kernel single-sigmoid + affine reproduces tanh on the g gate exactly.
    gate_scale = jnp.concatenate(
        [jnp.ones((2 * H,)), jnp.full((H,), 2.0), jnp.ones((H,))]
    ).astype(jnp.float32)                                         # (4H,)
    w_ih_t = p["w_ih"].T * gate_scale                             # (E, 4H)
    w_hh_t = p["w_hh"].T * gate_scale                             # (H, 4H)
    bias = ((p["b_ih"] + p["b_hh"]) * gate_scale).reshape(1, -1)  # (1, 4H)
    lstm_pack = jnp.concatenate([w_ih_t, w_hh_t, bias], axis=0)   # (E+H+1, 4H)

    # No nonlinearity between fc1/fc2/fc3 -> fold into one (OUT, H+CUBE) linear map.
    w_fold = p["fc3_w"] @ p["fc2_w"] @ p["fc1_w"]                              # (OUT, H+6)
    b_fold = p["fc3_w"] @ (p["fc2_w"] @ p["fc1_b"] + p["fc2_b"]) + p["fc3_b"]  # (OUT,)

    w_h = jnp.zeros((H, OUT_PAD), jnp.float32).at[:, :OUT_DIM].set(w_fold[:, :H].T)
    w_c = jnp.zeros((CUBE_PAD, OUT_PAD), jnp.float32).at[:CUBE_DIM, :OUT_DIM].set(
        w_fold[:, H:].T)
    b_h = jnp.zeros((1, OUT_PAD), jnp.float32).at[0, :OUT_DIM].set(b_fold)
    head_pack = jnp.concatenate([w_h, w_c, b_h], axis=0)          # (H+CUBE_PAD+1, 128)

    return lstm_pack.astype(jnp.float32), head_pack.astype(jnp.float32)


def lstm_model_forward(embeds, cube, lstm_pack, head_pack):
    """Pallas implementation of LSTM_model.forward (post-embedding)."""
    cube_pad = jnp.zeros((1, CUBE_PAD), jnp.float32).at[0, :CUBE_DIM].set(
        cube.astype(jnp.float32))
    vmem = lambda: pl.BlockSpec(memory_space=pltpu.MemorySpace.VMEM)
    out = pl.pallas_call(
        lstm_mlp_kernel,
        out_shape=jax.ShapeDtypeStruct((1, OUT_PAD), jnp.float32),
        in_specs=[vmem(), vmem(), vmem(), vmem()],
        out_specs=vmem(),
    )(embeds.astype(jnp.float32), lstm_pack, head_pack, cube_pad)
    return out[0, :OUT_DIM]                                       # (3,)


def reference_forward(embeds, cube, p):
    """Pure-JAX reference reproducing torch.nn.LSTM + Linear semantics."""
    H = HIDDEN_DIM

    def step(carry, x_t):
        h, c = carry
        gates = x_t @ p["w_ih"].T + h @ p["w_hh"].T + p["b_ih"] + p["b_hh"]
        i = jax.nn.sigmoid(gates[0 * H:1 * H])
        f = jax.nn.sigmoid(gates[1 * H:2 * H])
        g = jnp.tanh(gates[2 * H:3 * H])
        o = jax.nn.sigmoid(gates[3 * H:4 * H])
        c = f * c + i * g
        h = o * jnp.tanh(c)
        return (h, c), None

    (h, _), _ = jax.lax.scan(step, (jnp.zeros(H), jnp.zeros(H)), embeds)
    x = jnp.concatenate([h, cube]) @ p["fc1_w"].T + p["fc1_b"]
    x = x @ p["fc2_w"].T + p["fc2_b"]
    x = x @ p["fc3_w"].T + p["fc3_b"]
    return x


if __name__ == "__main__":
    key = jax.random.PRNGKey(0)
    k_param, k_emb, k_cube = jax.random.split(key, 3)

    params = init_params(k_param)
    # Synthetic embeddings standing in for calc_embeddings(sentence): (seq, 1, E) -> (seq, E)
    embeds = jax.random.normal(k_emb, (SEQ_LEN, EMBEDDING_DIM), jnp.float32)
    cube_dimension = jax.random.normal(k_cube, (CUBE_DIM,), jnp.float32)

    # One-time offline parameter folding/packing.
    lstm_pack, head_pack = pack_params(params)

    out = lstm_model_forward(embeds, cube_dimension, lstm_pack, head_pack)
    out = jax.block_until_ready(out)

    ref = reference_forward(embeds, cube_dimension, params)
    np.testing.assert_allclose(np.asarray(out), np.asarray(ref), rtol=5e-5, atol=5e-5)

    print("KERNEL_OK")
</pallas_src>

<mosaic_0001>
module attributes {stable_mosaic.version = 11 : i64} {
  func.func @lstm_mlp_kernel(%arg0: memref<8x16xf32, #tpu.memory_space<vmem>>, %arg1: memref<49x128xf32, #tpu.memory_space<vmem>>, %arg2: memref<41x128xf32, #tpu.memory_space<vmem>>, %arg3: memref<1x8xf32, #tpu.memory_space<vmem>>, %arg4: memref<1x128xf32, #tpu.memory_space<vmem>>) attributes {dimension_semantics = [], scalar_prefetch = 0 : i64, scratch_operands = 0 : i64, tpu.core_type = #tpu.core_type<tc>} {
    %c0 = arith.constant 0 : index
    %c0_0 = arith.constant 0 : index
    %0 = vector.load %arg1[%c0, %c0_0] : memref<49x128xf32, #tpu.memory_space<vmem>>, vector<16x128xf32>
    %c16 = arith.constant 16 : index
    %c0_1 = arith.constant 0 : index
    %1 = vector.load %arg1[%c16, %c0_1] : memref<49x128xf32, #tpu.memory_space<vmem>>, vector<32x128xf32>
    %c48 = arith.constant 48 : index
    %c0_2 = arith.constant 0 : index
    %2 = vector.load %arg1[%c48, %c0_2] : memref<49x128xf32, #tpu.memory_space<vmem>>, vector<1x128xf32>
    %c0_3 = arith.constant 0 : index
    %c0_4 = arith.constant 0 : index
    %3 = vector.load %arg0[%c0_3, %c0_4] : memref<8x16xf32, #tpu.memory_space<vmem>>, vector<8x16xf32>
    %cst = arith.constant dense<0.000000e+00> : vector<8x128xf32>
    %4 = tpu.matmul %3, %0, %cst {dimension_numbers = #tpu.dot_dimension_numbers<[1], [0], [0], [1], [0, 0, 1, 1], [], []>} : vector<8x16xf32>, vector<16x128xf32>, vector<8x128xf32> -> vector<8x128xf32>
    %5 = vector.broadcast %2 : vector<1x128xf32> to vector<8x128xf32>
    %6 = arith.addf %4, %5 : vector<8x128xf32>
    %7 = tpu.iota {dimensions = array<i32: 1>} : vector<1x128xi32>
    %c64_i32 = arith.constant 64 : i32
    %8 = vector.broadcast %c64_i32 : i32 to vector<1x128xi32>
    %9 = arith.cmpi sge, %7, %8 : vector<1x128xi32>
    %c96_i32 = arith.constant 96 : i32
    %10 = vector.broadcast %c96_i32 : i32 to vector<1x128xi32>
    %11 = arith.cmpi slt, %7, %10 : vector<1x128xi32>
    %12 = arith.andi %9, %11 : vector<1x128xi1>
    %cst_5 = arith.constant 2.000000e+00 : f32
    %cst_6 = arith.constant 1.000000e+00 : f32
    %13 = vector.broadcast %cst_5 : f32 to vector<1x128xf32>
    %14 = vector.broadcast %cst_6 : f32 to vector<1x128xf32>
    %15 = arith.select %12, %13, %14 : vector<1x128xi1>, vector<1x128xf32>
    %cst_7 = arith.constant -1.000000e+00 : f32
    %cst_8 = arith.constant 0.000000e+00 : f32
    %16 = vector.broadcast %cst_7 : f32 to vector<1x128xf32>
    %17 = vector.broadcast %cst_8 : f32 to vector<1x128xf32>
    %18 = arith.select %12, %16, %17 : vector<1x128xi1>, vector<1x128xf32>
    %cst_9 = arith.constant 0.000000e+00 : f32
    %19 = vector.broadcast %cst_9 : f32 to vector<1x32xf32>
    %cst_10 = arith.constant 0.000000e+00 : f32
    %20 = vector.broadcast %cst_10 : f32 to vector<1x32xf32>
    %21 = vector.extract_strided_slice %6 {offsets = [0, 0], sizes = [1, 128], strides = [1, 1]} : vector<8x128xf32> to vector<1x128xf32>
    %cst_11 = arith.constant dense<0.000000e+00> : vector<1x128xf32>
    %22 = tpu.matmul %19, %1, %cst_11 {dimension_numbers = #tpu.dot_dimension_numbers<[1], [0], [0], [1], [0, 0, 1, 1], [], []>} : vector<1x32xf32>, vector<32x128xf32>, vector<1x128xf32> -> vector<1x128xf32>
    %23 = arith.addf %21, %22 : vector<1x128xf32>
    %24 = arith.negf %23 : vector<1x128xf32>
    %25 = math.exp %24 : vector<1x128xf32>
    %cst_12 = arith.constant 1.000000e+00 : f32
    %26 = vector.broadcast %cst_12 : f32 to vector<1x128xf32>
    %27 = arith.addf %26, %25 : vector<1x128xf32>
    %28 = arith.divf %26, %27 : vector<1x128xf32>
    %29 = arith.mulf %28, %15 : vector<1x128xf32>
    %30 = arith.addf %29, %18 : vector<1x128xf32>
    %31 = vector.extract_strided_slice %30 {offsets = [0, 0], sizes = [1, 32], strides = [1, 1]} : vector<1x128xf32> to vector<1x32xf32>
    %32 = vector.extract_strided_slice %30 {offsets = [0, 32], sizes = [1, 32], strides = [1, 1]} : vector<1x128xf32> to vector<1x32xf32>
    %33 = vector.extract_strided_slice %30 {offsets = [0, 64], sizes = [1, 32], strides = [1, 1]} : vector<1x128xf32> to vector<1x32xf32>
    %34 = vector.extract_strided_slice %30 {offsets = [0, 96], sizes = [1, 32], strides = [1, 1]} : vector<1x128xf32> to vector<1x32xf32>
    %35 = arith.mulf %32, %20 : vector<1x32xf32>
    %36 = arith.mulf %31, %33 : vector<1x32xf32>
    %37 = arith.addf %35, %36 : vector<1x32xf32>
    %38 = math.tanh %37 : vector<1x32xf32>
    %39 = arith.mulf %34, %38 : vector<1x32xf32>
    %40 = vector.extract_strided_slice %6 {offsets = [1, 0], sizes = [1, 128], strides = [1, 1]} : vector<8x128xf32> to vector<1x128xf32>
    %cst_13 = arith.constant dense<0.000000e+00> : vector<1x128xf32>
    %41 = tpu.matmul %39, %1, %cst_13 {dimension_numbers = #tpu.dot_dimension_numbers<[1], [0], [0], [1], [0, 0, 1, 1], [], []>} : vector<1x32xf32>, vector<32x128xf32>, vector<1x128xf32> -> vector<1x128xf32>
    %42 = arith.addf %40, %41 : vector<1x128xf32>
    %43 = arith.negf %42 : vector<1x128xf32>
    %44 = math.exp %43 : vector<1x128xf32>
    %cst_14 = arith.constant 1.000000e+00 : f32
    %45 = vector.broadcast %cst_14 : f32 to vector<1x128xf32>
    %46 = arith.addf %45, %44 : vector<1x128xf32>
    %47 = arith.divf %45, %46 : vector<1x128xf32>
    %48 = arith.mulf %47, %15 : vector<1x128xf32>
    %49 = arith.addf %48, %18 : vector<1x128xf32>
    %50 = vector.extract_strided_slice %49 {offsets = [0, 0], sizes = [1, 32], strides = [1, 1]} : vector<1x128xf32> to vector<1x32xf32>
    %51 = vector.extract_strided_slice %49 {offsets = [0, 32], sizes = [1, 32], strides = [1, 1]} : vector<1x128xf32> to vector<1x32xf32>
    %52 = vector.extract_strided_slice %49 {offsets = [0, 64], sizes = [1, 32], strides = [1, 1]} : vector<1x128xf32> to vector<1x32xf32>
    %53 = vector.extract_strided_slice %49 {offsets = [0, 96], sizes = [1, 32], strides = [1, 1]} : vector<1x128xf32> to vector<1x32xf32>
    %54 = arith.mulf %51, %37 : vector<1x32xf32>
    %55 = arith.mulf %50, %52 : vector<1x32xf32>
    %56 = arith.addf %54, %55 : vector<1x32xf32>
    %57 = math.tanh %56 : vector<1x32xf32>
    %58 = arith.mulf %53, %57 : vector<1x32xf32>
    %59 = vector.extract_strided_slice %6 {offsets = [2, 0], sizes = [1, 128], strides = [1, 1]} : vector<8x128xf32> to vector<1x128xf32>
    %cst_15 = arith.constant dense<0.000000e+00> : vector<1x128xf32>
    %60 = tpu.matmul %58, %1, %cst_15 {dimension_numbers = #tpu.dot_dimension_numbers<[1], [0], [0], [1], [0, 0, 1, 1], [], []>} : vector<1x32xf32>, vector<32x128xf32>, vector<1x128xf32> -> vector<1x128xf32>
    %61 = arith.addf %59, %60 : vector<1x128xf32>
    %62 = arith.negf %61 : vector<1x128xf32>
    %63 = math.exp %62 : vector<1x128xf32>
    %cst_16 = arith.constant 1.000000e+00 : f32
    %64 = vector.broadcast %cst_16 : f32 to vector<1x128xf32>
    %65 = arith.addf %64, %63 : vector<1x128xf32>
    %66 = arith.divf %64, %65 : vector<1x128xf32>
    %67 = arith.mulf %66, %15 : vector<1x128xf32>
    %68 = arith.addf %67, %18 : vector<1x128xf32>
    %69 = vector.extract_strided_slice %68 {offsets = [0, 0], sizes = [1, 32], strides = [1, 1]} : vector<1x128xf32> to vector<1x32xf32>
    %70 = vector.extract_strided_slice %68 {offsets = [0, 32], sizes = [1, 32], strides = [1, 1]} : vector<1x128xf32> to vector<1x32xf32>
    %71 = vector.extract_strided_slice %68 {offsets = [0, 64], sizes = [1, 32], strides = [1, 1]} : vector<1x128xf32> to vector<1x32xf32>
    %72 = vector.extract_strided_slice %68 {offsets = [0, 96], sizes = [1, 32], strides = [1, 1]} : vector<1x128xf32> to vector<1x32xf32>
    %73 = arith.mulf %70, %56 : vector<1x32xf32>
    %74 = arith.mulf %69, %71 : vector<1x32xf32>
    %75 = arith.addf %73, %74 : vector<1x32xf32>
    %76 = math.tanh %75 : vector<1x32xf32>
    %77 = arith.mulf %72, %76 : vector<1x32xf32>
    %78 = vector.extract_strided_slice %6 {offsets = [3, 0], sizes = [1, 128], strides = [1, 1]} : vector<8x128xf32> to vector<1x128xf32>
    %cst_17 = arith.constant dense<0.000000e+00> : vector<1x128xf32>
    %79 = tpu.matmul %77, %1, %cst_17 {dimension_numbers = #tpu.dot_dimension_numbers<[1], [0], [0], [1], [0, 0, 1, 1], [], []>} : vector<1x32xf32>, vector<32x128xf32>, vector<1x128xf32> -> vector<1x128xf32>
    %80 = arith.addf %78, %79 : vector<1x128xf32>
    %81 = arith.negf %80 : vector<1x128xf32>
    %82 = math.exp %81 : vector<1x128xf32>
    %cst_18 = arith.constant 1.000000e+00 : f32
    %83 = vector.broadcast %cst_18 : f32 to vector<1x128xf32>
    %84 = arith.addf %83, %82 : vector<1x128xf32>
    %85 = arith.divf %83, %84 : vector<1x128xf32>
    %86 = arith.mulf %85, %15 : vector<1x128xf32>
    %87 = arith.addf %86, %18 : vector<1x128xf32>
    %88 = vector.extract_strided_slice %87 {offsets = [0, 0], sizes = [1, 32], strides = [1, 1]} : vector<1x128xf32> to vector<1x32xf32>
    %89 = vector.extract_strided_slice %87 {offsets = [0, 32], sizes = [1, 32], strides = [1, 1]} : vector<1x128xf32> to vector<1x32xf32>
    %90 = vector.extract_strided_slice %87 {offsets = [0, 64], sizes = [1, 32], strides = [1, 1]} : vector<1x128xf32> to vector<1x32xf32>
    %91 = vector.extract_strided_slice %87 {offsets = [0, 96], sizes = [1, 32], strides = [1, 1]} : vector<1x128xf32> to vector<1x32xf32>
    %92 = arith.mulf %89, %75 : vector<1x32xf32>
    %93 = arith.mulf %88, %90 : vector<1x32xf32>
    %94 = arith.addf %92, %93 : vector<1x32xf32>
    %95 = math.tanh %94 : vector<1x32xf32>
    %96 = arith.mulf %91, %95 : vector<1x32xf32>
    %97 = vector.extract_strided_slice %6 {offsets = [4, 0], sizes = [1, 128], strides = [1, 1]} : vector<8x128xf32> to vector<1x128xf32>
    %cst_19 = arith.constant dense<0.000000e+00> : vector<1x128xf32>
    %98 = tpu.matmul %96, %1, %cst_19 {dimension_numbers = #tpu.dot_dimension_numbers<[1], [0], [0], [1], [0, 0, 1, 1], [], []>} : vector<1x32xf32>, vector<32x128xf32>, vector<1x128xf32> -> vector<1x128xf32>
    %99 = arith.addf %97, %98 : vector<1x128xf32>
    %100 = arith.negf %99 : vector<1x128xf32>
    %101 = math.exp %100 : vector<1x128xf32>
    %cst_20 = arith.constant 1.000000e+00 : f32
    %102 = vector.broadcast %cst_20 : f32 to vector<1x128xf32>
    %103 = arith.addf %102, %101 : vector<1x128xf32>
    %104 = arith.divf %102, %103 : vector<1x128xf32>
    %105 = arith.mulf %104, %15 : vector<1x128xf32>
    %106 = arith.addf %105, %18 : vector<1x128xf32>
    %107 = vector.extract_strided_slice %106 {offsets = [0, 0], sizes = [1, 32], strides = [1, 1]} : vector<1x128xf32> to vector<1x32xf32>
    %108 = vector.extract_strided_slice %106 {offsets = [0, 32], sizes = [1, 32], strides = [1, 1]} : vector<1x128xf32> to vector<1x32xf32>
    %109 = vector.extract_strided_slice %106 {offsets = [0, 64], sizes = [1, 32], strides = [1, 1]} : vector<1x128xf32> to vector<1x32xf32>
    %110 = vector.extract_strided_slice %106 {offsets = [0, 96], sizes = [1, 32], strides = [1, 1]} : vector<1x128xf32> to vector<1x32xf32>
    %111 = arith.mulf %108, %94 : vector<1x32xf32>
    %112 = arith.mulf %107, %109 : vector<1x32xf32>
    %113 = arith.addf %111, %112 : vector<1x32xf32>
    %114 = math.tanh %113 : vector<1x32xf32>
    %115 = arith.mulf %110, %114 : vector<1x32xf32>
    %116 = vector.extract_strided_slice %6 {offsets = [5, 0], sizes = [1, 128], strides = [1, 1]} : vector<8x128xf32> to vector<1x128xf32>
    %cst_21 = arith.constant dense<0.000000e+00> : vector<1x128xf32>
    %117 = tpu.matmul %115, %1, %cst_21 {dimension_numbers = #tpu.dot_dimension_numbers<[1], [0], [0], [1], [0, 0, 1, 1], [], []>} : vector<1x32xf32>, vector<32x128xf32>, vector<1x128xf32> -> vector<1x128xf32>
    %118 = arith.addf %116, %117 : vector<1x128xf32>
    %119 = arith.negf %118 : vector<1x128xf32>
    %120 = math.exp %119 : vector<1x128xf32>
    %cst_22 = arith.constant 1.000000e+00 : f32
    %121 = vector.broadcast %cst_22 : f32 to vector<1x128xf32>
    %122 = arith.addf %121, %120 : vector<1x128xf32>
    %123 = arith.divf %121, %122 : vector<1x128xf32>
    %124 = arith.mulf %123, %15 : vector<1x128xf32>
    %125 = arith.addf %124, %18 : vector<1x128xf32>
    %126 = vector.extract_strided_slice %125 {offsets = [0, 0], sizes = [1, 32], strides = [1, 1]} : vector<1x128xf32> to vector<1x32xf32>
    %127 = vector.extract_strided_slice %125 {offsets = [0, 32], sizes = [1, 32], strides = [1, 1]} : vector<1x128xf32> to vector<1x32xf32>
    %128 = vector.extract_strided_slice %125 {offsets = [0, 64], sizes = [1, 32], strides = [1, 1]} : vector<1x128xf32> to vector<1x32xf32>
    %129 = vector.extract_strided_slice %125 {offsets = [0, 96], sizes = [1, 32], strides = [1, 1]} : vector<1x128xf32> to vector<1x32xf32>
    %130 = arith.mulf %127, %113 : vector<1x32xf32>
    %131 = arith.mulf %126, %128 : vector<1x32xf32>
    %132 = arith.addf %130, %131 : vector<1x32xf32>
    %133 = math.tanh %132 : vector<1x32xf32>
    %134 = arith.mulf %129, %133 : vector<1x32xf32>
    %135 = vector.extract_strided_slice %6 {offsets = [6, 0], sizes = [1, 128], strides = [1, 1]} : vector<8x128xf32> to vector<1x128xf32>
    %cst_23 = arith.constant dense<0.000000e+00> : vector<1x128xf32>
    %136 = tpu.matmul %134, %1, %cst_23 {dimension_numbers = #tpu.dot_dimension_numbers<[1], [0], [0], [1], [0, 0, 1, 1], [], []>} : vector<1x32xf32>, vector<32x128xf32>, vector<1x128xf32> -> vector<1x128xf32>
    %137 = arith.addf %135, %136 : vector<1x128xf32>
    %138 = arith.negf %137 : vector<1x128xf32>
    %139 = math.exp %138 : vector<1x128xf32>
    %cst_24 = arith.constant 1.000000e+00 : f32
    %140 = vector.broadcast %cst_24 : f32 to vector<1x128xf32>
    %141 = arith.addf %140, %139 : vector<1x128xf32>
    %142 = arith.divf %140, %141 : vector<1x128xf32>
    %143 = arith.mulf %142, %15 : vector<1x128xf32>
    %144 = arith.addf %143, %18 : vector<1x128xf32>
    %145 = vector.extract_strided_slice %144 {offsets = [0, 0], sizes = [1, 32], strides = [1, 1]} : vector<1x128xf32> to vector<1x32xf32>
    %146 = vector.extract_strided_slice %144 {offsets = [0, 32], sizes = [1, 32], strides = [1, 1]} : vector<1x128xf32> to vector<1x32xf32>
    %147 = vector.extract_strided_slice %144 {offsets = [0, 64], sizes = [1, 32], strides = [1, 1]} : vector<1x128xf32> to vector<1x32xf32>
    %148 = vector.extract_strided_slice %144 {offsets = [0, 96], sizes = [1, 32], strides = [1, 1]} : vector<1x128xf32> to vector<1x32xf32>
    %149 = arith.mulf %146, %132 : vector<1x32xf32>
    %150 = arith.mulf %145, %147 : vector<1x32xf32>
    %151 = arith.addf %149, %150 : vector<1x32xf32>
    %152 = math.tanh %151 : vector<1x32xf32>
    %153 = arith.mulf %148, %152 : vector<1x32xf32>
    %154 = vector.extract_strided_slice %6 {offsets = [7, 0], sizes = [1, 128], strides = [1, 1]} : vector<8x128xf32> to vector<1x128xf32>
    %cst_25 = arith.constant dense<0.000000e+00> : vector<1x128xf32>
    %155 = tpu.matmul %153, %1, %cst_25 {dimension_numbers = #tpu.dot_dimension_numbers<[1], [0], [0], [1], [0, 0, 1, 1], [], []>} : vector<1x32xf32>, vector<32x128xf32>, vector<1x128xf32> -> vector<1x128xf32>
    %156 = arith.addf %154, %155 : vector<1x128xf32>
    %157 = arith.negf %156 : vector<1x128xf32>
    %158 = math.exp %157 : vector<1x128xf32>
    %cst_26 = arith.constant 1.000000e+00 : f32
    %159 = vector.broadcast %cst_26 : f32 to vector<1x128xf32>
    %160 = arith.addf %159, %158 : vector<1x128xf32>
    %161 = arith.divf %159, %160 : vector<1x128xf32>
    %162 = arith.mulf %161, %15 : vector<1x128xf32>
    %163 = arith.addf %162, %18 : vector<1x128xf32>
    %164 = vector.extract_strided_slice %163 {offsets = [0, 0], sizes = [1, 32], strides = [1, 1]} : vector<1x128xf32> to vector<1x32xf32>
    %165 = vector.extract_strided_slice %163 {offsets = [0, 32], sizes = [1, 32], strides = [1, 1]} : vector<1x128xf32> to vector<1x32xf32>
    %166 = vector.extract_strided_slice %163 {offsets = [0, 64], sizes = [1, 32], strides = [1, 1]} : vector<1x128xf32> to vector<1x32xf32>
    %167 = vector.extract_strided_slice %163 {offsets = [0, 96], sizes = [1, 32], strides = [1, 1]} : vector<1x128xf32> to vector<1x32xf32>
    %168 = arith.mulf %165, %151 : vector<1x32xf32>
    %169 = arith.mulf %164, %166 : vector<1x32xf32>
    %170 = arith.addf %168, %169 : vector<1x32xf32>
    %171 = math.tanh %170 : vector<1x32xf32>
    %172 = arith.mulf %167, %171 : vector<1x32xf32>
    %c0_27 = arith.constant 0 : index
    %c0_28 = arith.constant 0 : index
    %173 = vector.load %arg2[%c0_27, %c0_28] : memref<41x128xf32, #tpu.memory_space<vmem>>, vector<32x128xf32>
    %c32 = arith.constant 32 : index
    %c0_29 = arith.constant 0 : index
    %174 = vector.load %arg2[%c32, %c0_29] : memref<41x128xf32, #tpu.memory_space<vmem>>, vector<8x128xf32>
    %c40 = arith.constant 40 : index
    %c0_30 = arith.constant 0 : index
    %175 = vector.load %arg2[%c40, %c0_30] : memref<41x128xf32, #tpu.memory_space<vmem>>, vector<1x128xf32>
    %cst_31 = arith.constant dense<0.000000e+00> : vector<1x128xf32>
    %176 = tpu.matmul %172, %173, %cst_31 {dimension_numbers = #tpu.dot_dimension_numbers<[1], [0], [0], [1], [0, 0, 1, 1], [], []>} : vector<1x32xf32>, vector<32x128xf32>, vector<1x128xf32> -> vector<1x128xf32>
    %c0_32 = arith.constant 0 : index
    %c0_33 = arith.constant 0 : index
    %177 = vector.load %arg3[%c0_32, %c0_33] : memref<1x8xf32, #tpu.memory_space<vmem>>, vector<1x8xf32>
    %cst_34 = arith.constant dense<0.000000e+00> : vector<1x128xf32>
    %178 = tpu.matmul %177, %174, %cst_34 {dimension_numbers = #tpu.dot_dimension_numbers<[1], [0], [0], [1], [0, 0, 1, 1], [], []>} : vector<1x8xf32>, vector<8x128xf32>, vector<1x128xf32> -> vector<1x128xf32>
    %179 = arith.addf %176, %178 : vector<1x128xf32>
    %180 = arith.addf %179, %175 : vector<1x128xf32>
    %c0_35 = arith.constant 0 : index
    %c0_36 = arith.constant 0 : index
    %181 = vector.load %arg4[%c0_35, %c0_36] : memref<1x128xf32, #tpu.memory_space<vmem>>, vector<1x128xf32>
    tpu.vector_store %arg4[%c0_35, %c0_36], %180 {strides = array<i32>} : memref<1x128xf32, #tpu.memory_space<vmem>>, vector<1x128xf32>,
    return
  }
}

</mosaic_0001>

<bundles_post_ra>
// kernel: tpu_custom_call.1
= control target key start
LH: loop header
LB: loop body
LE: loop exit
PB: predicated region body
PF: predicated region fallthrough
CT: control target
= control target key end

     0   :  { %9 = vsyncpa [#allocation3], 0  ;;  %s1799_s0 = inlined_call_operand.hbm [shape: f32[8,16], index: 0, kind: input, shape index: {}]   ;;  %s1800_s1 = inlined_call_operand.hbm [shape: f32[49,128], index: 1, kind: input, shape index: {}]   ;;  %s1801_s2 = inlined_call_operand.hbm [shape: f32[41,128], index: 2, kind: input, shape index: {}]   ;;  %s1802_s3 = inlined_call_operand.vmem [shape: f32[1,8], index: 3, kind: input, shape index: {}]   ;;  %s1803_s4 = inlined_call_operand.hbm [shape: f32[1,128], index: 4, kind: output, shape index: {}]  }
   0x1   :  { %10 = vsyncpa [#allocation6], 0 }
   0x2   :  { %11 = vsyncpa [#allocation4], 0  ;;  %s1571_s15 = smov [#allocation5]   ;;  %s1477_s19 = scalar_lea.hbm %s1800_s1, 896 }
   0x3   :  { %s27_s16 = sshll.u32 %s1571_s15, 4  ;;  %p1478_p0 = scmp.ne.s32.totalorder %s1800_s1, %s1477_s19  ;;  %s28_s16 = int_to_ptr.vmem [resolvable:$true] %s27_s16 }
   0x4   :  { %p1481_p1 = scmp.lt.u32.totalorder %s1477_s19, %s1800_s1 }
   0x6   :  { %p1483_p2 = pnand %p1481_p1, %p1478_p0 }
   0x8   :  { %1486 = shalt.err (!%p1483_p2)
}
   0x9   :  { %s1487_s24 = scalar_lea.vmem %s28_s16, 896  ;;  %p1492_p4 = scmp.lt.s32.totalorder %s28_s16, %s28_s16 }
   0xa   :  { %p1488_p3 = scmp.ne.s32.totalorder %s28_s16, %s1487_s24  ;;  %p1493_p5 = scmp.lt.s32.totalorder %s1487_s24, %s1487_s24 }
   0xc   :  { %p1494_p6 = por %p1493_p5, %p1492_p4 }
   0xe   :  { %p1495_p7 = pnand %p1494_p6, %p1488_p3 }
  0x10   :  { %1498 = shalt.err (!%p1495_p7)
}
  0x11   :  { %s1572_s25 = smov 128   ;;  %s1573_s26 = smov 8  }
  0x12   :  { %33 = dma.hbm_to_vmem [thread:$0]  %s1800_s1, 896, %s28_s16, [#allocation6], %s1572_s25, %s1572_s25, %s1573_s26  }
  0x13   :  { %s1574_s29 = smov [#allocation2]   ;;  %s1575_s5 = smov [#allocation7]  }
  0x14   :  { %s18_s30 = sshll.u32 %s1574_s29, 4  ;;  %s39_s6 = sshll.u32 %s1575_s5, 4  ;;  %s19_s30 = int_to_ptr.vmem [resolvable:$true] %s18_s30  ;;  %s40_s6 = int_to_ptr.vmem [resolvable:$true] %s39_s6 }
  0x15   :  { %s1499_s9 = scalar_lea.hbm %s1799_s0, 128 }
  0x16   :  { %p1500_p8 = scmp.ne.s32.totalorder %s1799_s0, %s1499_s9  ;;  %p1503_p9 = scmp.lt.u32.totalorder %s1499_s9, %s1799_s0 }
  0x18   :  { %p1505_p10 = pnand %p1503_p9, %p1500_p8 }
  0x1a   :  { %1508 = shalt.err (!%p1505_p10)
}
  0x1b   :  { %s1509_s1 = scalar_lea.vmem %s19_s30, 128  ;;  %p1514_p12 = scmp.lt.s32.totalorder %s19_s30, %s19_s30 }
  0x1c   :  { %p1510_p11 = scmp.ne.s32.totalorder %s19_s30, %s1509_s1  ;;  %p1515_p13 = scmp.lt.s32.totalorder %s1509_s1, %s1509_s1 }
  0x1e   :  { %p1516_p0 = por %p1515_p13, %p1514_p12 }
  0x20   :  { %p1517_p1 = pnand %p1516_p0, %p1510_p11 }
  0x22   :  { %1520 = shalt.err (!%p1517_p1)
}
  0x23   :  { %21 = dma.hbm_to_vmem [thread:$0]  %s1799_s0, 128, %s19_s30, [#allocation3]  }
  0x24   :  { %s1521_s18 = scalar_lea.hbm %s1801_s2, 768 }
  0x25   :  { %p1522_p2 = scmp.ne.s32.totalorder %s1801_s2, %s1521_s18  ;;  %p1525_p3 = scmp.lt.u32.totalorder %s1521_s18, %s1801_s2 }
  0x27   :  { %p1527_p4 = pnand %p1525_p3, %p1522_p2 }
  0x29   :  { %1530 = shalt.err (!%p1527_p4)
}
  0x2a   :  { %s1531_s23 = scalar_lea.vmem %s40_s6, 768  ;;  %p1536_p6 = scmp.lt.s32.totalorder %s40_s6, %s40_s6 }
  0x2b   :  { %p1532_p5 = scmp.ne.s32.totalorder %s40_s6, %s1531_s23  ;;  %p1537_p7 = scmp.lt.s32.totalorder %s1531_s23, %s1531_s23 }
  0x2d   :  { %p1538_p8 = por %p1537_p7, %p1536_p6 }
  0x2f   :  { %p1539_p9 = pnand %p1538_p8, %p1532_p5 }
  0x31   :  { %1542 = shalt.err (!%p1539_p9)
}
  0x32   :  { %45 = dma.hbm_to_vmem [thread:$0]  %s1801_s2, 768, %s40_s6, [#allocation6], %s1572_s25, %s1572_s25, %s1573_s26  }
  0x33   :  { %1565 = dma.done.wait [#allocation3], 128  }
  0x34   :  { %1566 = vsyncadd [#allocation3], 4294967168 }
  0x35   :  { %1567 = dma.done.wait [#allocation6], 1664  }
  0x36   :  { %1568 = vsyncadd [#allocation6], 4294965632  ;;  %v1576_v0 = vmov 0.0|0.0   ;;  %vm1577_vm0 = vmmov 0   ;;  %v1578_v1 = vmov 0.0   ;;  %v57_v2 = vld [vmem:[#allocation5] sm:$0xff]  ;;  %v143_v20 = vlaneseq }
  0x37   :  { %1360 = vmatprep.subr.bf16.mxu1 %v1576_v0  ;;  %1253 = vmatprep.mubr.msk.f32.mxu1 %vm1577_vm0, %v1578_v1  ;;  %v58_v3 = vld [vmem:[#allocation5 + $0x8] sm:$0xff]  ;;  %v59_v5 = vld [vmem:[#allocation5 + $0x10] sm:$0xff]  ;;  %v60_v6 = vld [vmem:[#allocation5 + $0x18] sm:$0xff]  ;;  %vm69_vm1 = vcmask 130048   ;;  %v1579_v24 = vmov 1.0   ;;  %s1580_s2 = smov 64  }
  0x38   :  { %1369 = vmatprep.subr.bf16.mxu0 %v1576_v0  ;;  %1275 = vmatprep.mubr.msk.f32.mxu0 %vm1577_vm0, %v1578_v1  ;;  %v1361_v4 = vpack.c.bf16 %v58_v3, %v57_v2  ;;  %v1656_v7 = vpack.c.bf16 %v60_v6, %v59_v5  ;;  %v64_v8 = vld [vmem:[#allocation2] sm:$0xff]  ;;  %v61_v9 = vld [vmem:[#allocation5 + $0x20] sm:$0xff]  ;;  %v62_v10 = vld [vmem:[#allocation5 + $0x28] sm:$0xff]  ;;  %v144_v23 = vand.u32 127, %v143_v20  ;;  %s1581_s25 = smov 32   ;;  %vm150_vm5 = vcmask 261120  }
  0x39   :  { %v1661_v11 = vpack.c.bf16 %v62_v10, %v61_v9  ;;  %v1180_v14 = vld [vmem:[#allocation5 + $0x30] ss:$0 sm:$0xff]  ;;  %vm1012_vm6 = vcmask 64512  }
  0x3a   :  { %1362 = vmatpush3.bf16.msra.mxu1 %v1361_v4  ;;  %1371 = vmatpush3.bf16.msra.mxu0 %v1656_v7  ;;  %vm145_vm2 = vcmp.ge.s32.totalorder %v144_v23, 64  ;;  %vm146_vm3 = vcmp.lt.s32.totalorder %v144_v23, 96 }
  0x3b   :  { %1363 = vmatprep.subr.bf16.mxu1 %v1576_v0  ;;  %1372 = vmatprep.subr.bf16.mxu0 %v1576_v0  ;;  %vm147_vm4 = vmand %vm145_vm2, %vm146_vm3 }
  0x3c   :  { %v1681_v25 = vsel %vm147_vm4, 2.0, %v1579_v24  ;;  %v1684_v27 = vsel %vm147_vm4, -1.0, %v1578_v1 }
  0x3d   :  { %1254 = vmatmul.mubr.msk.f32.vlgmr.msra.gmra.mrb[0].mxu1 %vm69_vm1, %v64_v8 }
  0x3e   :  { %1365 = vmatpush3.bf16.msra.mxu1 %v1656_v7  ;;  %1264 = vmatprep.mubr.msk.f32.mxu1 %vm1577_vm0, %v1578_v1 }
  0x3f   :  { %1366 = vmatprep.subr.bf16.mxu1 %v1576_v0  ;;  %1374 = vmatpush3.bf16.msra.mxu0 %v1661_v11 }
  0x40   :  { %1381 = vmatprep.subr.bf16.mxu0 %v1576_v0 }
  0x42   :  { %1368 = vmatpush3.bf16.msra.mxu1 %v1661_v11 }
  0x43   :  { %1375 = vmatprep.subr.bf16.mxu1 %v1576_v0 }
  0x45   :  { %1265 = vmatmul.mubr.f32.vlgmr.msra.gmra.mrb[2].mxu1 %v1578_v1 }
  0x46   :  { %1377 = vmatpush3.bf16.msra.mxu1 %v1656_v7  ;;  %1286 = vmatprep.mubr.msk.f32.mxu1 %vm1577_vm0, %v1578_v1 }
  0x47   :  { %1378 = vmatprep.subr.bf16.mxu1 %v1576_v0 }
  0x4a   :  { %1380 = vmatpush3.bf16.msra.mxu1 %v1661_v11 }
  0x4b   :  { %1387 = vmatprep.subr.bf16.mxu1 %v1576_v0 }
 0x110   :  { %v139_v12 = vpop.f32.mrb[0].mxu1 }
 0x111   :  { %v1255_v13 = vpop.f32.mrb[1].mxu1  ;;  %v1678_v15 = vadd.f32 %v1180_v14, %v139_v12 }
 0x118   :  { %v220_v16 = vpop.f32.mrb[2].mxu1 }
 0x119   :  { %v224_v17 = vadd.f32 %v220_v16, %v1678_v15  ;;  %v1266_v18 = vpop.f32.mrb[3].mxu1 }
 0x11b   :  { %v1182_v19 = vmul.f32 -1.442695, %v224_v17 }
 0x11d   :  { %1429 = vpow2.f32 %v1182_v19 }
 0x127   :  { %v1430_v21 = vpop.eup %1429 }
 0x128   :  { %v228_v22 = vadd.f32 1.0, %v1430_v21 }
 0x12a   :  { %1431 = vrcp.f32 %v228_v22 }
 0x134   :  { %v1432_v26 = vpop.eup %1431 }
 0x135   :  { %v231_v28 = vmul.f32 %v1432_v26, %v1681_v25 }
 0x137   :  { %v232_v29 = vadd.f32 %v231_v28, %v1684_v27 }
 0x139   :  { %235 = vrot.lane.b32.xlu0 %v232_v29, %s1580_s2  ;;  %v233_v32 = vmul.f32 0.0, %v232_v29 }
 0x1ab   :  { %v236_v30 = vpop.permute.xlu0 %235 }
 0x1ac   :  { %v238_v31 = vmul.f32 %v236_v30, %v232_v29 }
 0x1ae   :  { %240 = vrot.lane.b32.xlu0 %v238_v31, %s1581_s25 }
 0x220   :  { %v241_v33 = vpop.permute.xlu0 %240 }
 0x221   :  { %v243_v34 = vadd.f32 %v241_v33, %v233_v32 }
 0x223   :  { %1433 = vtanh.f32 %v243_v34  ;;  %v338_v51 = vrot.slane %v243_v34, 7 }
 0x22d   :  { %v1434_v35 = vpop.eup %1433 }
 0x22e   :  { %246 = vrot.lane.b32.xlu1 %v1434_v35, %s1580_s2 }
 0x2a0   :  { %v247_v36 = vpop.permute.xlu1 %246 }
 0x2a1   :  { %v249_v37 = vmul.f32 %v247_v36, %v232_v29 }
 0x2a3   :  { %251 = vrot.lane.b32.xlu1 %v249_v37, %s1581_s25 }
 0x315   :  { %v252_v38 = vpop.permute.xlu1 %251 }
 0x316   :  { %1276 = vmatmul.mubr.msk.f32.vlgmr.msra.gmra.mrb[0].mxu0 %vm150_vm5, %v252_v38 }
 0x317   :  { %1383 = vmatpush3.bf16.msra.mxu0 %v1656_v7  ;;  %1297 = vmatprep.mubr.msk.f32.mxu0 %vm1577_vm0, %v1578_v1 }
 0x318   :  { %1384 = vmatprep.subr.bf16.mxu0 %v1576_v0 }
 0x31b   :  { %1386 = vmatpush3.bf16.msra.mxu0 %v1661_v11 }
 0x31c   :  { %1393 = vmatprep.subr.bf16.mxu0 %v1576_v0 }
 0x3e9   :  { %v321_v39 = vpop.f32.mrb[0].mxu0 }
 0x3ea   :  { %v326_v40 = vrot.slane %v321_v39, 7  ;;  %v1277_v41 = vpop.f32.mrb[1].mxu0 }
 0x3ec   :  { %v328_v42 = vadd.f32 %v326_v40, %v1678_v15 }
 0x3ee   :  { %v1184_v43 = vmul.f32 -1.442695, %v328_v42 }
 0x3f0   :  { %1435 = vpow2.f32 %v1184_v43 }
 0x3fa   :  { %v1436_v44 = vpop.eup %1435 }
 0x3fb   :  { %v332_v45 = vadd.f32 1.0, %v1436_v44 }
 0x3fd   :  { %1437 = vrcp.f32 %v332_v45 }
 0x407   :  { %v1438_v46 = vpop.eup %1437 }
 0x408   :  { %v335_v47 = vmul.f32 %v1438_v46, %v1681_v25 }
 0x40a   :  { %v336_v48 = vadd.f32 %v335_v47, %v1684_v27 }
 0x40c   :  { %342 = vrot.lane.b32.xlu0 %v336_v48, %s1580_s2  ;;  %v340_v52 = vmul.f32 %v338_v51, %v336_v48 }
 0x47e   :  { %v343_v49 = vpop.permute.xlu0 %342 }
 0x47f   :  { %v345_v50 = vmul.f32 %v343_v49, %v336_v48 }
 0x481   :  { %347 = vrot.lane.b32.xlu1 %v345_v50, %s1581_s25 }
 0x4f3   :  { %v348_v53 = vpop.permute.xlu1 %347 }
 0x4f4   :  { %v350_v54 = vadd.f32 %v348_v53, %v340_v52 }
 0x4f6   :  { %1439 = vtanh.f32 %v350_v54  ;;  %v446_v12 = vrot.slane %v350_v54, 7 }
 0x500   :  { %v1440_v55 = vpop.eup %1439 }
 0x501   :  { %353 = vrot.lane.b32.xlu0 %v1440_v55, %s1580_s2 }
 0x573   :  { %v354_v56 = vpop.permute.xlu0 %353 }
 0x574   :  { %v356_v57 = vmul.f32 %v354_v56, %v336_v48 }
 0x576   :  { %v358_v58 = vrot.slane %v356_v57, 1 }
 0x578   :  { %359 = vrot.lane.b32.xlu1 %v358_v58, %s1581_s25 }
 0x5ea   :  { %v360_v59 = vpop.permute.xlu1 %359 }
 0x5eb   :  { %1287 = vmatmul.mubr.msk.f32.vlgmr.msra.gmra.mrb[4].mxu1 %vm150_vm5, %v360_v59 }
 0x5ec   :  { %1389 = vmatpush3.bf16.msra.mxu1 %v1656_v7  ;;  %1308 = vmatprep.mubr.msk.f32.mxu1 %vm1577_vm0, %v1578_v1 }
 0x5ed   :  { %1390 = vmatprep.subr.bf16.mxu1 %v1576_v0 }
 0x5f0   :  { %1392 = vmatpush3.bf16.msra.mxu1 %v1661_v11 }
 0x5f1   :  { %1399 = vmatprep.subr.bf16.mxu1 %v1576_v0 }
 0x6be   :  { %v429_v60 = vpop.f32.mrb[4].mxu1 }
 0x6bf   :  { %v434_v61 = vrot.slane %v429_v60, 6  ;;  %v1288_v62 = vpop.f32.mrb[5].mxu1 }
 0x6c1   :  { %v436_v63 = vadd.f32 %v434_v61, %v1678_v15 }
 0x6c3   :  { %v1186_v2 = vmul.f32 -1.442695, %v436_v63 }
 0x6c5   :  { %1441 = vpow2.f32 %v1186_v2 }
 0x6cf   :  { %v1442_v3 = vpop.eup %1441 }
 0x6d0   :  { %v440_v4 = vadd.f32 1.0, %v1442_v3 }
 0x6d2   :  { %1443 = vrcp.f32 %v440_v4 }
 0x6dc   :  { %v1444_v5 = vpop.eup %1443 }
 0x6dd   :  { %v443_v6 = vmul.f32 %v1444_v5, %v1681_v25 }
 0x6df   :  { %v444_v8 = vadd.f32 %v443_v6, %v1684_v27 }
 0x6e1   :  { %450 = vrot.lane.b32.xlu0 %v444_v8, %s1580_s2  ;;  %v448_v13 = vmul.f32 %v446_v12, %v444_v8 }
 0x753   :  { %v451_v9 = vpop.permute.xlu0 %450 }
 0x754   :  { %v453_v10 = vmul.f32 %v451_v9, %v444_v8 }
 0x756   :  { %455 = vrot.lane.b32.xlu1 %v453_v10, %s1581_s25 }
 0x7c8   :  { %v456_v14 = vpop.permute.xlu1 %455 }
 0x7c9   :  { %v458_v16 = vadd.f32 %v456_v14, %v448_v13 }
 0x7cb   :  { %1445 = vtanh.f32 %v458_v16  ;;  %v554_v36 = vrot.slane %v458_v16, 7 }
 0x7d5   :  { %v1446_v17 = vpop.eup %1445 }
 0x7d6   :  { %461 = vrot.lane.b32.xlu0 %v1446_v17, %s1580_s2 }
 0x848   :  { %v462_v18 = vpop.permute.xlu0 %461 }
 0x849   :  { %v464_v19 = vmul.f32 %v462_v18, %v444_v8 }
 0x84b   :  { %v466_v20 = vrot.slane %v464_v19, 2 }
 0x84d   :  { %467 = vrot.lane.b32.xlu1 %v466_v20, %s1581_s25 }
 0x8bf   :  { %v468_v21 = vpop.permute.xlu1 %467 }
 0x8c0   :  { %1298 = vmatmul.mubr.msk.f32.vlgmr.msra.gmra.mrb[2].mxu0 %vm150_vm5, %v468_v21 }
 0x8c1   :  { %1395 = vmatpush3.bf16.msra.mxu0 %v1656_v7  ;;  %1319 = vmatprep.mubr.msk.f32.mxu0 %vm1577_vm0, %v1578_v1 }
 0x8c2   :  { %1396 = vmatprep.subr.bf16.mxu0 %v1576_v0 }
 0x8c5   :  { %1398 = vmatpush3.bf16.msra.mxu0 %v1661_v11 }
 0x8c6   :  { %1405 = vmatprep.subr.bf16.mxu0 %v1576_v0 }
 0x993   :  { %v537_v22 = vpop.f32.mrb[2].mxu0 }
 0x994   :  { %v542_v23 = vrot.slane %v537_v22, 5  ;;  %v1299_v24 = vpop.f32.mrb[3].mxu0 }
 0x996   :  { %v544_v26 = vadd.f32 %v542_v23, %v1678_v15 }
 0x998   :  { %v1188_v28 = vmul.f32 -1.442695, %v544_v26 }
 0x99a   :  { %1447 = vpow2.f32 %v1188_v28 }
 0x9a4   :  { %v1448_v29 = vpop.eup %1447 }
 0x9a5   :  { %v548_v30 = vadd.f32 1.0, %v1448_v29 }
 0x9a7   :  { %1449 = vrcp.f32 %v548_v30 }
 0x9b1   :  { %v1450_v31 = vpop.eup %1449 }
 0x9b2   :  { %v551_v32 = vmul.f32 %v1450_v31, %v1681_v25 }
 0x9b4   :  { %v552_v33 = vadd.f32 %v551_v32, %v1684_v27 }
 0x9b6   :  { %558 = vrot.lane.b32.xlu0 %v552_v33, %s1580_s2  ;;  %v556_v37 = vmul.f32 %v554_v36, %v552_v33 }
 0xa28   :  { %v559_v34 = vpop.permute.xlu0 %558 }
 0xa29   :  { %v561_v35 = vmul.f32 %v559_v34, %v552_v33 }
 0xa2b   :  { %563 = vrot.lane.b32.xlu1 %v561_v35, %s1581_s25 }
 0xa9d   :  { %v564_v38 = vpop.permute.xlu1 %563 }
 0xa9e   :  { %v566_v39 = vadd.f32 %v564_v38, %v556_v37 }
 0xaa0   :  { %1451 = vtanh.f32 %v566_v39  ;;  %v662_v57 = vrot.slane %v566_v39, 7 }
 0xaaa   :  { %v1452_v40 = vpop.eup %1451 }
 0xaab   :  { %569 = vrot.lane.b32.xlu0 %v1452_v40, %s1580_s2 }
 0xb1d   :  { %v570_v41 = vpop.permute.xlu0 %569 }
 0xb1e   :  { %v572_v42 = vmul.f32 %v570_v41, %v552_v33 }
 0xb20   :  { %v574_v43 = vrot.slane %v572_v42, 3 }
 0xb22   :  { %575 = vrot.lane.b32.xlu1 %v574_v43, %s1581_s25 }
 0xb94   :  { %v576_v44 = vpop.permute.xlu1 %575 }
 0xb95   :  { %1309 = vmatmul.mubr.msk.f32.vlgmr.msra.gmra.mrb[6].mxu1 %vm150_vm5, %v576_v44 }
 0xb96   :  { %1401 = vmatpush3.bf16.msra.mxu1 %v1656_v7  ;;  %1330 = vmatprep.mubr.msk.f32.mxu1 %vm1577_vm0, %v1578_v1 }
 0xb97   :  { %1402 = vmatprep.subr.bf16.mxu1 %v1576_v0 }
 0xb9a   :  { %1404 = vmatpush3.bf16.msra.mxu1 %v1661_v11 }
 0xb9b   :  { %1344 = vmatprep.subr.mxu1 %v1578_v1 }
 0xc68   :  { %v645_v45 = vpop.f32.mrb[6].mxu1 }
 0xc69   :  { %v650_v46 = vrot.slane %v645_v45, 4  ;;  %v1310_v47 = vpop.f32.mrb[7].mxu1 }
 0xc6b   :  { %v652_v48 = vadd.f32 %v650_v46, %v1678_v15 }
 0xc6d   :  { %v1190_v49 = vmul.f32 -1.442695, %v652_v48 }
 0xc6f   :  { %1453 = vpow2.f32 %v1190_v49 }
 0xc79   :  { %v1454_v50 = vpop.eup %1453 }
 0xc7a   :  { %v656_v51 = vadd.f32 1.0, %v1454_v50 }
 0xc7c   :  { %1455 = vrcp.f32 %v656_v51 }
 0xc86   :  { %v1456_v52 = vpop.eup %1455 }
 0xc87   :  { %v659_v53 = vmul.f32 %v1456_v52, %v1681_v25 }
 0xc89   :  { %v660_v54 = vadd.f32 %v659_v53, %v1684_v27 }
 0xc8b   :  { %666 = vrot.lane.b32.xlu0 %v660_v54, %s1580_s2  ;;  %v664_v58 = vmul.f32 %v662_v57, %v660_v54 }
 0xcfd   :  { %v667_v55 = vpop.permute.xlu0 %666 }
 0xcfe   :  { %v669_v56 = vmul.f32 %v667_v55, %v660_v54 }
 0xd00   :  { %671 = vrot.lane.b32.xlu1 %v669_v56, %s1581_s25 }
 0xd72   :  { %v672_v59 = vpop.permute.xlu1 %671 }
 0xd73   :  { %v674_v60 = vadd.f32 %v672_v59, %v664_v58 }
 0xd75   :  { %1457 = vtanh.f32 %v674_v60  ;;  %v770_v17 = vrot.slane %v674_v60, 7 }
 0xd7f   :  { %v1458_v61 = vpop.eup %1457 }
 0xd80   :  { %677 = vrot.lane.b32.xlu0 %v1458_v61, %s1580_s2 }
 0xdf2   :  { %v678_v62 = vpop.permute.xlu0 %677 }
 0xdf3   :  { %v680_v63 = vmul.f32 %v678_v62, %v660_v54 }
 0xdf5   :  { %v682_v2 = vrot.slane %v680_v63, 4  ;;  %v1005_v63 = vld [vmem:[#allocation7] sm:$0xff] }
 0xdf7   :  { %683 = vrot.lane.b32.xlu1 %v682_v2, %s1581_s25  ;;  %v1006_v2 = vld [vmem:[#allocation7 + $0x8] sm:$0xff] }
 0xe69   :  { %v684_v3 = vpop.permute.xlu1 %683 }
 0xe6a   :  { %1320 = vmatmul.mubr.msk.f32.vlgmr.msra.gmra.mrb[4].mxu0 %vm150_vm5, %v684_v3  ;;  %v1009_v3 = vld [vmem:[#allocation7 + $0x20] sm:$0xff] }
 0xe6b   :  { %1407 = vmatpush3.bf16.msra.mxu0 %v1656_v7  ;;  %1341 = vmatprep.mubr.msk.f32.mxu0 %vm1577_vm0, %v1578_v1 }
 0xe6c   :  { %1408 = vmatprep.subr.bf16.mxu0 %v1576_v0 }
 0xe6f   :  { %1410 = vmatpush3.bf16.msra.mxu0 %v1661_v11 }
 0xe70   :  { %1411 = vmatprep.subr.bf16.mxu0 %v1576_v0 }
 0xf3d   :  { %v753_v4 = vpop.f32.mrb[4].mxu0 }
 0xf3e   :  { %v758_v5 = vrot.slane %v753_v4, 3  ;;  %v1321_v6 = vpop.f32.mrb[5].mxu0  ;;  %v1412_v4 = vpack.c.bf16 %v1006_v2, %v1005_v63 }
 0xf40   :  { %v760_v8 = vadd.f32 %v758_v5, %v1678_v15  ;;  %v1008_v5 = vld [vmem:[#allocation7 + $0x18] sm:$0xff] }
 0xf42   :  { %v1192_v9 = vmul.f32 -1.442695, %v760_v8 }
 0xf44   :  { %1459 = vpow2.f32 %v1192_v9 }
 0xf4e   :  { %v1460_v10 = vpop.eup %1459 }
 0xf4f   :  { %v764_v12 = vadd.f32 1.0, %v1460_v10 }
 0xf51   :  { %1461 = vrcp.f32 %v764_v12 }
 0xf5b   :  { %v1462_v7 = vpop.eup %1461 }
 0xf5c   :  { %v767_v13 = vmul.f32 %v1462_v7, %v1681_v25 }
 0xf5e   :  { %v768_v14 = vadd.f32 %v767_v13, %v1684_v27 }
 0xf60   :  { %774 = vrot.lane.b32.xlu0 %v768_v14, %s1580_s2  ;;  %v772_v18 = vmul.f32 %v770_v17, %v768_v14 }
 0xfd2   :  { %v775_v11 = vpop.permute.xlu0 %774 }
 0xfd3   :  { %v777_v16 = vmul.f32 %v775_v11, %v768_v14  ;;  %v1010_v11 = vld [vmem:[#allocation7 + $0x28] sm:$0x1] }
 0xfd5   :  { %779 = vrot.lane.b32.xlu1 %v777_v16, %s1581_s25 }
0x1047   :  { %v780_v19 = vpop.permute.xlu1 %779 }
0x1048   :  { %v782_v20 = vadd.f32 %v780_v19, %v772_v18 }
0x104a   :  { %1463 = vtanh.f32 %v782_v20  ;;  %v878_v40 = vrot.slane %v782_v20, 7 }
0x1054   :  { %v1464_v21 = vpop.eup %1463 }
0x1055   :  { %785 = vrot.lane.b32.xlu0 %v1464_v21, %s1580_s2 }
0x10c7   :  { %v786_v22 = vpop.permute.xlu0 %785 }
0x10c8   :  { %v788_v23 = vmul.f32 %v786_v22, %v768_v14 }
0x10ca   :  { %v790_v24 = vrot.slane %v788_v23, 5 }
0x10cc   :  { %791 = vrot.lane.b32.xlu1 %v790_v24, %s1581_s25 }
0x113e   :  { %v792_v26 = vpop.permute.xlu1 %791 }
0x113f   :  { %1331 = vmatmul.mubr.msk.f32.vlgmr.msra.gmra.mrb[8].mxu1 %vm150_vm5, %v792_v26 }
0x1140   :  { %1346 = vmatprep.mubr.msk.f32.mxu1 %vm1577_vm0, %v1578_v1  ;;  %1345 = vmatpush3.msra.mxu1 %v1009_v3 }
0x1212   :  { %v861_v28 = vpop.f32.mrb[8].mxu1 }
0x1213   :  { %v866_v29 = vrot.slane %v861_v28, 2  ;;  %v1332_v30 = vpop.f32.mrb[9].mxu1 }
0x1215   :  { %v868_v31 = vadd.f32 %v866_v29, %v1678_v15 }
0x1217   :  { %v1194_v32 = vmul.f32 -1.442695, %v868_v31 }
0x1219   :  { %1465 = vpow2.f32 %v1194_v32 }
0x1223   :  { %v1466_v33 = vpop.eup %1465 }
0x1224   :  { %v872_v34 = vadd.f32 1.0, %v1466_v33 }
0x1226   :  { %1467 = vrcp.f32 %v872_v34 }
0x1230   :  { %v1468_v35 = vpop.eup %1467 }
0x1231   :  { %v875_v36 = vmul.f32 %v1468_v35, %v1681_v25 }
0x1233   :  { %v876_v37 = vadd.f32 %v875_v36, %v1684_v27 }
0x1235   :  { %882 = vrot.lane.b32.xlu0 %v876_v37, %s1580_s2  ;;  %v880_v41 = vmul.f32 %v878_v40, %v876_v37 }
0x12a7   :  { %v883_v38 = vpop.permute.xlu0 %882 }
0x12a8   :  { %v885_v39 = vmul.f32 %v883_v38, %v876_v37 }
0x12aa   :  { %887 = vrot.lane.b32.xlu1 %v885_v39, %s1581_s25 }
0x131c   :  { %v888_v42 = vpop.permute.xlu1 %887 }
0x131d   :  { %v890_v43 = vadd.f32 %v888_v42, %v880_v41 }
0x131f   :  { %1469 = vtanh.f32 %v890_v43 }
0x1329   :  { %v1470_v44 = vpop.eup %1469 }
0x132a   :  { %893 = vrot.lane.b32.xlu0 %v1470_v44, %s1580_s2 }
0x139c   :  { %v894_v45 = vpop.permute.xlu0 %893 }
0x139d   :  { %v896_v46 = vmul.f32 %v894_v45, %v876_v37 }
0x139f   :  { %v898_v47 = vrot.slane %v896_v46, 6 }
0x13a1   :  { %899 = vrot.lane.b32.xlu1 %v898_v47, %s1581_s25 }
0x1413   :  { %v900_v48 = vpop.permute.xlu1 %899 }
0x1414   :  { %1342 = vmatmul.mubr.msk.f32.vlgmr.msra.gmra.mrb[6].mxu0 %vm150_vm5, %v900_v48 }
0x1415   :  { %1357 = vmatprep.mubr.msk.f32.mxu0 %vm1577_vm0, %v1578_v1  ;;  %v986_v1 = vrot.slane %v890_v43, 7  ;;  %1413 = vmatpush3.bf16.msra.mxu0 %v1412_v4 }
0x1416   :  { %1414 = vmatprep.subr.bf16.mxu0 %v1576_v0 }
0x14e7   :  { %v969_v49 = vpop.f32.mrb[6].mxu0 }
0x14e8   :  { %v974_v50 = vrot.slane %v969_v49, 1  ;;  %v1343_v51 = vpop.f32.mrb[7].mxu0 }
0x14ea   :  { %v976_v52 = vadd.f32 %v974_v50, %v1678_v15 }
0x14ec   :  { %v1196_v53 = vmul.f32 -1.442695, %v976_v52 }
0x14ee   :  { %1471 = vpow2.f32 %v1196_v53 }
0x14f8   :  { %v1472_v54 = vpop.eup %1471 }
0x14f9   :  { %v980_v55 = vadd.f32 1.0, %v1472_v54 }
0x14fb   :  { %1473 = vrcp.f32 %v980_v55 }
0x1505   :  { %v1474_v56 = vpop.eup %1473 }
0x1506   :  { %v983_v57 = vmul.f32 %v1474_v56, %v1681_v25  ;;  %v1007_v25 = vld [vmem:[#allocation7 + $0x10] sm:$0xff] }
0x1507   :  { %v1415_v6 = vpack.c.bf16 %v1008_v5, %v1007_v25 }
0x1508   :  { %v984_v58 = vadd.f32 %v983_v57, %v1684_v27  ;;  %v1011_v27 = vld [vmem:[%s1802_s3] sm:$0x1]  ;;  %s1582_s3 = smov [#allocation8]  }
0x1509   :  { %1347 = vmatmul.mubr.msk.f32.vlgmr.msra.gmra.mrb[10].mxu1 %vm1012_vm6, %v1011_v27  ;;  %1416 = vmatpush3.bf16.msra.mxu0 %v1415_v6  ;;  %s1170_s28 = sshll.u32 %s1582_s3, 4  ;;  %s1171_s28 = int_to_ptr.vmem [resolvable:$true] %s1170_s28 }
0x150a   :  { %990 = vrot.lane.b32.xlu0 %v984_v58, %s1580_s2  ;;  %v988_v61 = vmul.f32 %v986_v1, %v984_v58  ;;  %s1543_s29 = scalar_lea.vmem %s1171_s28, 16  ;;  %s1547_s30 = scalar_lea.vmem %s1171_s28, 32 }
0x150b   :  { %p1544_p10 = scmp.ne.s32.totalorder %s1171_s28, %s1543_s29  ;;  %p1548_p11 = scmp.lt.s32.totalorder %s1171_s28, %s1171_s28 }
0x150c   :  { %p1549_p12 = scmp.lt.s32.totalorder %s1547_s30, %s1543_s29 }
0x150e   :  { %p1550_p13 = por %p1549_p12, %p1548_p11 }
0x1510   :  { %p1551_p0 = pnand %p1550_p13, %p1544_p10 }
0x157c   :  { %v991_v59 = vpop.permute.xlu0 %990 }
0x157d   :  { %v993_v60 = vmul.f32 %v991_v59, %v984_v58 }
0x157f   :  { %995 = vrot.lane.b32.xlu1 %v993_v60, %s1581_s25 }
0x15dc   :  { %v1082_v7 = vpop.f32.mrb[10].mxu1 }
0x15dd   :  { %v1348_v13 = vpop.f32.mrb[11].mxu1 }
0x15f1   :  { %v996_v62 = vpop.permute.xlu1 %995 }
0x15f2   :  { %v998_v15 = vadd.f32 %v996_v62, %v988_v61 }
0x15f4   :  { %1475 = vtanh.f32 %v998_v15 }
0x15fe   :  { %v1476_v8 = vpop.eup %1475 }
0x15ff   :  { %1001 = vrot.lane.b32.xlu0 %v1476_v8, %s1580_s2 }
0x1671   :  { %v1002_v9 = vpop.permute.xlu0 %1001 }
0x1672   :  { %v1004_v10 = vmul.f32 %v1002_v9, %v984_v58 }
0x1674   :  { %v1087_v12 = vrot.slane %v1004_v10, 7 }
0x1676   :  { %1088 = vrot.lane.b32.xlu1 %v1087_v12, %s1581_s25 }
0x16e8   :  { %v1089_v14 = vpop.permute.xlu1 %1088 }
0x16e9   :  { %1358 = vmatmul.mubr.msk.f32.vlgmr.msra.gmra.mrb[8].mxu0 %vm150_vm5, %v1089_v14 }
0x17bc   :  { %v1158_v16 = vpop.f32.mrb[8].mxu0 }
0x17bd   :  { %v1159_v17 = vadd.f32 %v1158_v16, %v1082_v7  ;;  %v1359_v0 = vpop.f32.mrb[9].mxu0 }
0x17bf   :  { %v1162_v18 = vadd.f32 %v1159_v17, %v1010_v11 }
0x17c1   :  { %1163 = vst [vmem:[#allocation8] sm:$0x1] %v1162_v18 }
0x17c2   :  { %1554 = shalt.err (!%p1551_p0)
}
0x17c3   :  { %s1555_s7 = scalar_lea.hbm %s1803_s4, 16 }
0x17c4   :  { %p1556_p1 = scmp.ne.s32.totalorder %s1803_s4, %s1555_s7  ;;  %p1559_p2 = scmp.lt.u32.totalorder %s1555_s7, %s1803_s4 }
0x17c6   :  { %p1561_p3 = pnand %p1559_p2, %p1556_p1 }
0x17c8   :  { %1564 = shalt.err (!%p1561_p3)
}
0x17c9   :  { %1173 = dma.vmem_to_hbm [thread:$0]  %s1171_s28, 16, %s1803_s4, [#allocation4]  }
0x17ca   :  { %1569 = dma.done.wait [#allocation4], 16  }
0x17cb   :  { %1570 = vsyncadd [#allocation4], 4294967280 }
0x17cc   :  { %1177 = vsyncpa [#allocation3], 1 }
0x17cd   :  { %1178 = vsyncpa [#allocation6], 1 }
0x17ce   :  { %1179 = vsyncpa [#allocation4], 1 }

</bundles_post_ra>
